<compile_context>
chip_gen: v7x
topology: tpu7x:2x2x1
jax: 0.10.0
libtpu: 0.0.40
codegen_flags: <defaults>
</compile_context>

<pallas_src>
import functools

import jax
import jax.numpy as jnp
from jax import lax
from jax.experimental import pallas as pl
from jax.experimental.pallas import tpu as pltpu


def attention_head_kernel(x_ref, wqkv_ref, wo_ref, o_ref,
                          q_scr, k_scr, v_scr, *, q_tile: int):
    # x_ref    : (1, S, Hp) bf16   full sequence (needed once for QKV)
    # wqkv_ref : (Hp, 3*Dhp) bf16  pre-transposed [scale*Wq | Wk | Wv], padded
    # wo_ref   : (Dhp, Hp) bf16    pre-transposed, head_dim_mask folded in
    # o_ref    : (1, q_tile, Hp)
    # q/k/v_scr: (S, Dhp) bf16     VMEM caches, persist across the qi axis
    qi = pl.program_id(1)
    dhp = q_scr.shape[1]

    # ---- once per batch element: fused QKV projection, cached in VMEM ----
    @pl.when(qi == 0)
    def _():
        x_full = x_ref[0]                                              # (S, Hp) bf16
        qkv = jnp.dot(x_full, wqkv_ref[...],
                      preferred_element_type=jnp.float32)              # (S, 3*Dhp) f32
        q_scr[...] = qkv[:, 0:dhp].astype(jnp.bfloat16)
        k_scr[...] = qkv[:, dhp:2 * dhp].astype(jnp.bfloat16)
        v_scr[...] = qkv[:, 2 * dhp:3 * dhp].astype(jnp.bfloat16)

    # ---- per q tile: attention for q_tile query rows over all S keys ----
    row0 = pl.multiple_of(qi * q_tile, q_tile)
    q = q_scr[pl.ds(row0, q_tile), :]                                  # (q_tile, Dhp) bf16
    k = k_scr[...]                                                     # (S, Dhp) bf16
    v = v_scr[...]                                                     # (S, Dhp) bf16

    # Scores: contract last-vs-last dims -> no materialized transpose of K.
    # (softmax scale already folded into Wq on the host.)
    s = lax.dot_general(q, k,
                        dimension_numbers=(((1,), (1,)), ((), ())),
                        preferred_element_type=jnp.float32)            # (q_tile, S)

    # Numerically stable softmax in f32; denominator via EUP approx reciprocal.
    s = s - jnp.max(s, axis=-1, keepdims=True)
    p = jnp.exp(s)
    a = p * pl.reciprocal(jnp.sum(p, axis=-1, keepdims=True), approx=True)

    h = jnp.dot(a.astype(jnp.bfloat16), v,
                preferred_element_type=jnp.float32)                    # (q_tile, Dhp)

    # Output projection: head_dim_mask already folded into Wo on the host.
    y = jnp.dot(h.astype(jnp.bfloat16), wo_ref[...],
                preferred_element_type=jnp.float32)                    # (q_tile, Hp)
    o_ref[0] = y.astype(o_ref.dtype)


def _round_up(n: int, m: int) -> int:
    return -(-n // m) * m


def attention_head(x, w_q, w_k, w_v, w_o, head_dim_mask=None, *, q_tile_max: int = 256):
    """x: (B, S, H) f32.  w_q/w_k/w_v: (Dh, H).  w_o: (H, Dh).  mask: (Dh,) int."""
    B, S, H = x.shape
    Dh = w_q.shape[0]
    if head_dim_mask is None:
        head_dim_mask = jnp.ones((Dh,), jnp.int32)

    # Lane-friendly padded dims (multiples of 128); zero padding is exact.
    Hp = max(128, _round_up(H, 128))
    Dhp = max(128, _round_up(Dh, 128))

    scale = 1.0 / (Dh ** 0.5)

    def pad2(a, rows, cols):
        return jnp.pad(a, ((0, rows - a.shape[0]), (0, cols - a.shape[1])))

    # Host-side (one-time) weight transforms: transpose, fold scale into Wq,
    # fold head_dim_mask into Wo, fuse QKV along N, pad, cast to bf16.
    wq_t = (w_q * scale).T                                             # (H, Dh)
    wk_t = w_k.T
    wv_t = w_v.T
    wqkv = jnp.concatenate(
        [pad2(wq_t, Hp, Dhp), pad2(wk_t, Hp, Dhp), pad2(wv_t, Hp, Dhp)],
        axis=1).astype(jnp.bfloat16)                                   # (Hp, 3*Dhp)
    wo_masked = (w_o * head_dim_mask[None, :].astype(w_o.dtype)).T     # (Dh, H)
    wo_t = pad2(wo_masked, Dhp, Hp).astype(jnp.bfloat16)               # (Dhp, Hp)

    # x: pad hidden dim and cast to bf16 on the host (halves DMA bytes vs f32).
    x_p = jnp.pad(x, ((0, 0), (0, 0), (0, Hp - H))).astype(jnp.bfloat16)  # (B, S, Hp)

    # q-row tiling: largest 8-aligned tile <= q_tile_max that divides S.
    q_tile = S
    if S > q_tile_max:
        for t in range(q_tile_max, 7, -8):
            if S % t == 0:
                q_tile = t
                break
    nq = S // q_tile

    # Per-generation VMEM scoped limit (~3/4 of physical, capped at 100 MiB).
    try:
        vmem_cap = pltpu.get_tpu_info().vmem_capacity_bytes
    except Exception:
        vmem_cap = 64 * 1024 * 1024
    vmem_limit = min(int(vmem_cap * 3 // 4), 100 * 1024 * 1024)

    kernel = functools.partial(attention_head_kernel, q_tile=q_tile)

    out_p = pl.pallas_call(
        kernel,
        out_shape=jax.ShapeDtypeStruct((B, S, Hp), x.dtype),
        grid_spec=pltpu.PrefetchScalarGridSpec(
            num_scalar_prefetch=0,
            grid=(B, nq),
            in_specs=[
                pl.BlockSpec((1, S, Hp), lambda b, qi: (b, 0, 0)),      # x (full seq)
                pl.BlockSpec((Hp, 3 * Dhp), lambda b, qi: (0, 0)),      # fused QKV weight
                pl.BlockSpec((Dhp, Hp), lambda b, qi: (0, 0)),          # output weight
            ],
            out_specs=pl.BlockSpec((1, q_tile, Hp), lambda b, qi: (b, qi, 0)),
            scratch_shapes=[
                pltpu.VMEM((S, Dhp), jnp.bfloat16),   # Q cache
                pltpu.VMEM((S, Dhp), jnp.bfloat16),   # K cache
                pltpu.VMEM((S, Dhp), jnp.bfloat16),   # V cache
            ],
        ),
        compiler_params=pltpu.CompilerParams(
            # B "parallel" for megacore; qi "arbitrary" so the Q/K/V scratch
            # computed at qi == 0 legitimately persists across the q tiles.
            dimension_semantics=("parallel", "arbitrary"),
            vmem_limit_bytes=vmem_limit,
        ),
    )(x_p, wqkv, wo_t)

    # Drop the hidden-dim padding outside the kernel.
    return out_p[:, :, :H]


def reference_attention_head(x, w_q, w_k, w_v, w_o, head_dim_mask, head_dim):
    """Pure-JAX (f32) reference mirroring the PyTorch module."""
    q = x @ w_q.T
    k = x @ w_k.T
    v = x @ w_v.T
    a = jax.nn.softmax(q @ jnp.swapaxes(k, -1, -2) / head_dim ** 0.5, axis=-1)
    h = a @ v
    return (head_dim_mask.astype(x.dtype)[None, None, :] * h) @ w_o.T


if __name__ == "__main__":
    B, S, HIDDEN, HEAD_DIM = 2, 8, 32, 16

    key = jax.random.PRNGKey(0)
    kx, kq, kk, kv, ko = jax.random.split(key, 5)

    def u(k, shape, fan_in):
        lim = 1.0 / (fan_in ** 0.5)
        return jax.random.uniform(k, shape, jnp.float32, -lim, lim)

    x = jax.random.normal(kx, (B, S, HIDDEN), jnp.float32)
    w_q = u(kq, (HEAD_DIM, HIDDEN), HIDDEN)
    w_k = u(kk, (HEAD_DIM, HIDDEN), HIDDEN)
    w_v = u(kv, (HEAD_DIM, HIDDEN), HIDDEN)
    w_o = u(ko, (HIDDEN, HEAD_DIM), HEAD_DIM)
    head_dim_mask = jnp.ones((HEAD_DIM,), jnp.int32)

    out = attention_head(x, w_q, w_k, w_v, w_o, head_dim_mask)
    out = jax.block_until_ready(out)

    ref = reference_attention_head(x, w_q, w_k, w_v, w_o, head_dim_mask, HEAD_DIM)
    assert out.shape == (B, S, HIDDEN)
    # bf16 MXU inputs (f32 accumulation) + approx reciprocal -> looser tolerance.
    assert jnp.allclose(out, ref, atol=5e-2, rtol=5e-2), "mismatch vs JAX reference"

    print("KERNEL_OK")
</pallas_src>

<mosaic_0001>
module attributes {stable_mosaic.version = 11 : i64} {
  func.func @attention_head_kernel(%arg0: i32, %arg1: i32, %arg2: memref<1x8x128xbf16, #tpu.memory_space<vmem>>, %arg3: memref<128x384xbf16, #tpu.memory_space<vmem>>, %arg4: memref<128x128xbf16, #tpu.memory_space<vmem>>, %arg5: memref<1x8x128xf32, #tpu.memory_space<vmem>>, %arg6: memref<8x128xbf16, #tpu.memory_space<vmem>>, %arg7: memref<8x128xbf16, #tpu.memory_space<vmem>>, %arg8: memref<8x128xbf16, #tpu.memory_space<vmem>>) attributes {dimension_semantics = [#tpu.dimension_semantics<parallel>, #tpu.dimension_semantics<arbitrary>], iteration_bounds = array<i64: 2, 1>, scalar_prefetch = 0 : i64, scratch_operands = 3 : i64, tpu.core_type = #tpu.core_type<tc>, window_params = [{transform_indices = @transform_0, window_bounds = array<i64: 1, 8, 128>}, {pipeline_mode = #tpu.pipeline_mode<synchronous>, transform_indices = @transform_1, window_bounds = array<i64: 128, 384>}, {pipeline_mode = #tpu.pipeline_mode<synchronous>, transform_indices = @transform_2, window_bounds = array<i64: 128, 128>}, {transform_indices = @transform_3, window_bounds = array<i64: 1, 8, 128>}]} {
    %c0_i32 = arith.constant 0 : i32
    %0 = arith.cmpi eq, %arg1, %c0_i32 : i32
    %1 = arith.extui %0 : i1 to i32
    %c0_i32_0 = arith.constant 0 : i32
    %2 = arith.cmpi ne, %1, %c0_i32_0 : i32
    scf.if %2 {
      %c0_14 = arith.constant 0 : index
      %c0_15 = arith.constant 0 : index
      %c0_16 = arith.constant 0 : index
      %28 = vector.load %arg2[%c0_14, %c0_15, %c0_16] : memref<1x8x128xbf16, #tpu.memory_space<vmem>>, vector<1x8x128xbf16>
      %29 = vector.shape_cast %28 : vector<1x8x128xbf16> to vector<8x128xbf16>
      %c0_17 = arith.constant 0 : index
      %c0_18 = arith.constant 0 : index
      %30 = vector.load %arg3[%c0_17, %c0_18] : memref<128x384xbf16, #tpu.memory_space<vmem>>, vector<128x384xbf16>
      %cst_19 = arith.constant dense<0.000000e+00> : vector<8x384xf32>
      %31 = tpu.matmul %29, %30, %cst_19 {dimension_numbers = #tpu.dot_dimension_numbers<[1], [0], [0], [1], [0, 0, 1, 1], [], []>} : vector<8x128xbf16>, vector<128x384xbf16>, vector<8x384xf32> -> vector<8x384xf32>
      %32 = vector.extract_strided_slice %31 {offsets = [0, 0], sizes = [8, 128], strides = [1, 1]} : vector<8x384xf32> to vector<8x128xf32>
      %33 = arith.truncf %32 : vector<8x128xf32> to vector<8x128xbf16>
      %c0_20 = arith.constant 0 : index
      %c0_21 = arith.constant 0 : index
      %34 = vector.load %arg6[%c0_20, %c0_21] : memref<8x128xbf16, #tpu.memory_space<vmem>>, vector<8x128xbf16>
      tpu.vector_store %arg6[%c0_20, %c0_21], %33 {strides = array<i32>} : memref<8x128xbf16, #tpu.memory_space<vmem>>, vector<8x128xbf16>,
      %35 = vector.extract_strided_slice %31 {offsets = [0, 128], sizes = [8, 128], strides = [1, 1]} : vector<8x384xf32> to vector<8x128xf32>
      %36 = arith.truncf %35 : vector<8x128xf32> to vector<8x128xbf16>
      %c0_22 = arith.constant 0 : index
      %c0_23 = arith.constant 0 : index
      %37 = vector.load %arg7[%c0_22, %c0_23] : memref<8x128xbf16, #tpu.memory_space<vmem>>, vector<8x128xbf16>
      tpu.vector_store %arg7[%c0_22, %c0_23], %36 {strides = array<i32>} : memref<8x128xbf16, #tpu.memory_space<vmem>>, vector<8x128xbf16>,
      %38 = vector.extract_strided_slice %31 {offsets = [0, 256], sizes = [8, 128], strides = [1, 1]} : vector<8x384xf32> to vector<8x128xf32>
      %39 = arith.truncf %38 : vector<8x128xf32> to vector<8x128xbf16>
      %c0_24 = arith.constant 0 : index
      %c0_25 = arith.constant 0 : index
      %40 = vector.load %arg8[%c0_24, %c0_25] : memref<8x128xbf16, #tpu.memory_space<vmem>>, vector<8x128xbf16>
      tpu.vector_store %arg8[%c0_24, %c0_25], %39 {strides = array<i32>} : memref<8x128xbf16, #tpu.memory_space<vmem>>, vector<8x128xbf16>,
    } else {
    }
    %c8_i32 = arith.constant 8 : i32
    %3 = arith.muli %arg1, %c8_i32 : i32
    %4 = tpu.assume_multiple %3, 8 : i32
    %5 = arith.index_cast %4 : i32 to index
    %c0 = arith.constant 0 : index
    %6 = vector.load %arg6[%5, %c0] : memref<8x128xbf16, #tpu.memory_space<vmem>>, vector<8x128xbf16>
    %c0_1 = arith.constant 0 : index
    %c0_2 = arith.constant 0 : index
    %7 = vector.load %arg7[%c0_1, %c0_2] : memref<8x128xbf16, #tpu.memory_space<vmem>>, vector<8x128xbf16>
    %c0_3 = arith.constant 0 : index
    %c0_4 = arith.constant 0 : index
    %8 = vector.load %arg8[%c0_3, %c0_4] : memref<8x128xbf16, #tpu.memory_space<vmem>>, vector<8x128xbf16>
    %cst = arith.constant dense<0.000000e+00> : vector<8x8xf32>
    %9 = tpu.matmul %6, %7, %cst {dimension_numbers = #tpu.dot_dimension_numbers<[1], [1], [0], [0], [0, 0, 1, 0], [], []>} : vector<8x128xbf16>, vector<8x128xbf16>, vector<8x8xf32> -> vector<8x8xf32>
    %cst_5 = arith.constant dense<0xFF800000> : vector<8xf32>
    %10 = vector.multi_reduction <maximumf>, %9, %cst_5 [1] : vector<8x8xf32> to vector<8xf32>
    %11 = vector.shape_cast %10 : vector<8xf32> to vector<8x1xf32>
    %12 = vector.broadcast %11 : vector<8x1xf32> to vector<8x8xf32>
    %13 = arith.subf %9, %12 : vector<8x8xf32>
    %14 = math.exp %13 : vector<8x8xf32>
    %cst_6 = arith.constant dense<0.000000e+00> : vector<8xf32>
    %15 = vector.multi_reduction <add>, %14, %cst_6 [1] : vector<8x8xf32> to vector<8xf32>
    %16 = vector.shape_cast %15 : vector<8xf32> to vector<8x1xf32>
    %17 = tpu.reciprocal %16 {approx = true} : vector<8x1xf32> -> vector<8x1xf32>
    %18 = vector.broadcast %17 : vector<8x1xf32> to vector<8x8xf32>
    %19 = arith.mulf %14, %18 : vector<8x8xf32>
    %20 = arith.truncf %19 : vector<8x8xf32> to vector<8x8xbf16>
    %cst_7 = arith.constant dense<0.000000e+00> : vector<8x128xf32>
    %21 = tpu.matmul %20, %8, %cst_7 {dimension_numbers = #tpu.dot_dimension_numbers<[1], [0], [0], [1], [0, 0, 1, 1], [], []>} : vector<8x8xbf16>, vector<8x128xbf16>, vector<8x128xf32> -> vector<8x128xf32>
    %22 = arith.truncf %21 : vector<8x128xf32> to vector<8x128xbf16>
    %c0_8 = arith.constant 0 : index
    %c0_9 = arith.constant 0 : index
    %23 = vector.load %arg4[%c0_8, %c0_9] : memref<128x128xbf16, #tpu.memory_space<vmem>>, vector<128x128xbf16>
    %cst_10 = arith.constant dense<0.000000e+00> : vector<8x128xf32>
    %24 = tpu.matmul %22, %23, %cst_10 {dimension_numbers = #tpu.dot_dimension_numbers<[1], [0], [0], [1], [0, 0, 1, 1], [], []>} : vector<8x128xbf16>, vector<128x128xbf16>, vector<8x128xf32> -> vector<8x128xf32>
    %c0_11 = arith.constant 0 : index
    %c0_12 = arith.constant 0 : index
    %c0_13 = arith.constant 0 : index
    %25 = vector.load %arg5[%c0_11, %c0_12, %c0_13] : memref<1x8x128xf32, #tpu.memory_space<vmem>>, vector<1x8x128xf32>
    %26 = vector.shape_cast %25 : vector<1x8x128xf32> to vector<8x128xf32>
    %27 = vector.shape_cast %24 : vector<8x128xf32> to vector<1x8x128xf32>
    tpu.vector_store %arg5[%c0_11, %c0_12, %c0_13], %27 {strides = array<i32>} : memref<1x8x128xf32, #tpu.memory_space<vmem>>, vector<1x8x128xf32>,
    return
  }
  func.func @transform_0(%arg0: i32, %arg1: i32) -> (i32, i32, i32) {
    %c0_i32 = arith.constant 0 : i32
    %c0_i32_0 = arith.constant 0 : i32
    %c0_i32_1 = arith.constant 0 : i32
    return %arg0, %c0_i32, %c0_i32_0 : i32, i32, i32
  }
  func.func @transform_1(%arg0: i32, %arg1: i32) -> (i32, i32) {
    %c0_i32 = arith.constant 0 : i32
    %c0_i32_0 = arith.constant 0 : i32
    %c0_i32_1 = arith.constant 0 : i32
    return %c0_i32, %c0_i32_0 : i32, i32
  }
  func.func @transform_2(%arg0: i32, %arg1: i32) -> (i32, i32) {
    %c0_i32 = arith.constant 0 : i32
    %c0_i32_0 = arith.constant 0 : i32
    %c0_i32_1 = arith.constant 0 : i32
    return %c0_i32, %c0_i32_0 : i32, i32
  }
  func.func @transform_3(%arg0: i32, %arg1: i32) -> (i32, i32, i32) {
    %c0_i32 = arith.constant 0 : i32
    %c0_i32_0 = arith.constant 0 : i32
    return %arg0, %arg1, %c0_i32 : i32, i32, i32
  }
}

</mosaic_0001>

<bundles_post_ra>
// kernel: tpu_custom_call.1
= control target key start
LH: loop header
LB: loop body
LE: loop exit
PB: predicated region body
PF: predicated region fallthrough
CT: control target
= control target key end

     0   :  { %8 = vsyncpa [#allocation6], 0  ;;  %s1557_s0 = inlined_call_operand.hbm [shape: bf16[2,8,128], index: 0, kind: input, shape index: {}]   ;;  %s1558_s1 = inlined_call_operand.hbm [shape: bf16[128,384], index: 1, kind: input, shape index: {}]   ;;  %s1559_s2 = inlined_call_operand.hbm [shape: bf16[128,128], index: 2, kind: input, shape index: {}]   ;;  %s1560_s3 = inlined_call_operand.hbm [shape: f32[2,8,128], index: 3, kind: output, shape index: {}]  }
   0x1   :  { %10 = vsyncpa [#allocation6 + $0x1], 0 }
   0x2   :  { %11 = vsyncpa [#allocation9], 0 }
   0x3   :  { %12 = vsyncpa [#allocation7], 0 }
   0x4   :  { %14 = vsyncpa [#allocation7 + $0x1], 0  ;;  %s1274_s12 = smov 0   ;;  %s1276_s13 = smov 0  }
   0x5   :  { %s1278_s14 = smov 0   ;;  %s1280_s15 = smov 0  }
   0x6   :  { %s1282_s16 = smov 0   ;;  %s1284_s17 = smov 0  }
   0x7 LB: > { %s811_s18 = sadd.s32 4294967295, %s1241_s17   ;;  %s812_s19 = sadd.s32 4294967294, %s1241_s17   ;;  %s1241_s17 = sphi %s1284_s17, %s20_s17   ;;  %s1237_s16 = sphi %s1282_s16, %s1582_s16   ;;  %s1233_s15 = sphi %s1280_s15, %s1581_s15   ;;  %s1229_s14 = sphi %s1278_s14, %s1580_s14   ;;  %s1225_s13 = sphi %s1276_s13, %s1579_s13   ;;  %s1221_s12 = sphi %s1274_s12, %s1578_s12  }
   0x8   : > { %p52_p0 = scmp.ne.s32.totalorder %s1225_s13, %s1221_s12  ;;  %p1308_p1 = scmp.eq.s32.totalorder %s811_s18, 0 }
   0x9   : > { %p1312_p2 = scmp.eq.s32.totalorder %s811_s18, 1  ;;  %p126_p3 = scmp.eq.s32.totalorder %s812_s19, 1 }
   0xa   : > { %s1565_s20 = scalar_select %p1308_p1, 1, 0 }
   0xb   : > { %p1318_p4 = por %p1308_p1, %p52_p0  ;;  %p813_p5 = scmp.ge.s32.totalorder %s1241_s17, 1 }
   0xc   : > { %p1323_p6 = por %p126_p3, %p52_p0  ;;  %p133_p7 = scmp.lt.s32.totalorder %s1241_s17, 3 }
   0xd   : > { %s1567_s22 = scalar_select %p1318_p4, 1, 0 }
   0xe   : > { %s1568_s23 = scalar_select %p1323_p6, 1, 0 }
   0xf   : > { %p1328_p8 = pnand %p813_p5, %p133_p7  ;;  %s1243_s25 = smov [#allocation8]  }
  0x10   : > { %s145_s26 = sshll.u32 %s1243_s25, 4  ;;  %s1244_s28 = smov [#allocation10]   ;;  %s1332_s26 = int_to_ptr.vmem [resolvable:$true] %s145_s26 }
  0x11   : > { %p947_p9 = pneg %p1328_p8  ;;  %s158_s29 = sshll.u32 %s1244_s28, 4  ;;  %s1343_s29 = int_to_ptr.vmem [resolvable:$true] %s158_s29 }
  0x12   : > { %s1069_s5 = scalar_lea.hbm %s1558_s1, 3072 }
  0x13   : > { %p1339_p11 = pnand %p947_p9, %p1308_p1  ;;  %p1070_p12 = scmp.ne.s32.totalorder %s1558_s1, %s1069_s5 }
  0x14   : > { %p1076_p5 = scmp.lt.u32.totalorder %s1069_s5, %s1558_s1 }
  0x15   : > { %p1071_p13 = pneg %p1339_p11 }
  0x17   : > { %p1072_p0 = pnand %p1071_p13, %p1070_p12 }
  0x19   : > { %p1073_p3 = pneg %p1072_p0 }
  0x1b   : > { %p1078_p7 = pnand %p1076_p5, %p1073_p3 }
  0x1d   : > { %1081 = shalt.err (!%p1078_p7)
}
  0x1e   : > { %s1082_s10 = scalar_lea.vmem %s1332_s26, 3072  ;;  %p1090_p1 = scmp.lt.s32.totalorder %s1332_s26, %s1332_s26 }
  0x1f   : > { %p1083_p9 = scmp.ne.s32.totalorder %s1332_s26, %s1082_s10  ;;  %p1091_p12 = scmp.lt.s32.totalorder %s1082_s10, %s1082_s10 }
  0x21   : > { %p1085_p10 = pnand %p1083_p9, %p1071_p13  ;;  %p1092_p0 = por %p1091_p12, %p1090_p1 }
  0x23   : > { %p1086_p6 = pneg %p1085_p10 }
  0x25   : > { %p1093_p4 = pnand %p1092_p0, %p1086_p6 }
  0x27   : > { %1096 = shalt.err (!%p1093_p4)
}
  0x28   : > { %s1245_s11 = smov 192   ;;  %s1246_s18 = smov 12  }
  0x29   : > { %950 = dma.hbm_to_vmem [thread:$0]  (!%p1339_p11), %s1558_s1, 3072, %s1332_s26, [#allocation9], %s1245_s11, %s1245_s11, %s1246_s18  }
  0x2a   : > { %s1097_s4 = scalar_lea.hbm %s1559_s2, 1024 }
  0x2b   : > { %p1098_p1 = scmp.ne.s32.totalorder %s1559_s2, %s1097_s4  ;;  %p1104_p10 = scmp.lt.u32.totalorder %s1097_s4, %s1559_s2 }
  0x2d   : > { %p1100_p4 = pnand %p1098_p1, %p1071_p13 }
  0x2f   : > { %p1101_p6 = pneg %p1100_p4 }
  0x31   : > { %p1106_p3 = pnand %p1104_p10, %p1101_p6 }
  0x33   : > { %1109 = shalt.err (!%p1106_p3)
}
  0x34   : > { %s1110_s26 = scalar_lea.vmem %s1343_s29, 1024  ;;  %p1118_p12 = scmp.lt.s32.totalorder %s1343_s29, %s1343_s29 }
  0x35   : > { %p1111_p5 = scmp.ne.s32.totalorder %s1343_s29, %s1110_s26  ;;  %p1119_p0 = scmp.lt.s32.totalorder %s1110_s26, %s1110_s26 }
  0x37   : > { %p1113_p7 = pnand %p1111_p5, %p1071_p13  ;;  %p1120_p1 = por %p1119_p0, %p1118_p12 }
  0x39   : > { %p1114_p9 = pneg %p1113_p7 }
  0x3b   : > { %p1121_p4 = pnand %p1120_p1, %p1114_p9 }
  0x3d   : > { %1124 = shalt.err (!%p1121_p4)
}
  0x3e   : > { %s1247_s9 = smov 64   ;;  %s1248_s10 = smov 4  }
  0x3f   : > { %953 = dma.hbm_to_vmem [thread:$0]  (!%p1339_p11), %s1559_s2, 1024, %s1343_s29, [#allocation9], %s1247_s9, %s1247_s9, %s1248_s10  }
  0x40   : > { %s32_s19 = sadd.s32 1, %s1237_s16  ;;  %s39_s25 = sadd.s32 1, %s1229_s14 }
  0x41   : > { %p34_p13 = scmp.ge.s32.totalorder %s32_s19, 2  ;;  %p46_p6 = scmp.ne.s32.totalorder %s1229_s14, %s1225_s13 }
  0x42   : > { %p47_p10 = scmp.eq.s32.totalorder %s1241_s17, 0  ;;  %p964_p3 = scmp.lt.s32.totalorder %s1241_s17, 2 }
  0x43   : > { %s1584_s19 = smov (%p34_p13, %s32_s19), 0  ;;  %p1407_p7 = por %p1312_p2, %p46_p6 }
  0x44   : > { %p48_p5 = por %p47_p10, %p46_p6  ;;  %s36_s27 = ssub.s32 %s1237_s16, %s1584_s19 }
  0x45   : > { %s1571_s28 = scalar_select %p1407_p7, 1, 0 }
  0x46   : > { %s172_s30 = sand.u32 1, %s1229_s14   ;;  %p37_p9 = scmp.eq.s32.totalorder %s36_s27, 0 }
  0x47   : > { %s817_s29 = sshll.u32 %s172_s30, 2  ;;  %s818_s4 = sshll.u32 %s1237_s16, 6 }
  0x48   : > { %s1416_s5 = scalar_select %p37_p9, %s1229_s14, %s39_s25  }
  0x49   : > { %s1421_s8 = scalar_lea.hbm %s1557_s0, %s818_s4  ;;  %s176_s21 = scalar_lea.vmem [#allocation5], %s817_s29 }
  0x4a   : > { %s183_s26 = sshll.u32 %s176_s21, 4  ;;  %p1425_p2 = pnand %p964_p3, %p48_p5  ;;  %s1429_s26 = int_to_ptr.vmem [resolvable:$true] %s183_s26 }
  0x4b   : > { %s173_s10 = scalar_lea.sflag [#allocation6], %s172_s30  ;;  %s1125_s11 = scalar_lea.hbm %s1421_s8, 64 }
  0x4c   : > { %p1126_p11 = scmp.ne.s32.totalorder %s1421_s8, %s1125_s11  ;;  %p1127_p12 = pneg %p1425_p2 }
  0x4d   : > { %s1130_s27 = scalar_lea.hbm %s1557_s0, 128  ;;  %p1131_p4 = scmp.lt.u32.totalorder %s1421_s8, %s1557_s0 }
  0x4e   : > { %p1128_p0 = pnand %p1127_p12, %p1126_p11  ;;  %p1132_p13 = scmp.lt.u32.totalorder %s1130_s27, %s1125_s11 }
  0x4f   : > { %p1134_p10 = scmp.lt.u32.totalorder %s1125_s11, %s1421_s8 }
  0x50   : > { %p1129_p1 = pneg %p1128_p0  ;;  %p1133_p6 = por %p1132_p13, %p1131_p4 }
  0x52   : > { %p1135_p3 = por %p1134_p10, %p1133_p6 }
  0x54   : > { %p1136_p5 = pnand %p1135_p3, %p1129_p1 }
  0x56   : > { %1139 = shalt.err (!%p1136_p5)
}
  0x57   : > { %s1140_s30 = scalar_lea.vmem %s1429_s26, 64  ;;  %s1249_s6 = smov [#allocation5]  }
  0x58   : > { %p1141_p9 = scmp.ne.s32.totalorder %s1429_s26, %s1140_s30  ;;  %s1145_s7 = sshll.u32 %s1249_s6, 4  ;;  %s1146_s7 = int_to_ptr.vmem [resolvable:$false] %s1145_s7 }
  0x59   : > { %s1147_s21 = scalar_lea.vmem %s1146_s7, 128  ;;  %p1148_p7 = scmp.lt.s32.totalorder %s1429_s26, %s1146_s7 }
  0x5a   : > { %p1143_p11 = pnand %p1141_p9, %p1127_p12  ;;  %p1149_p4 = scmp.lt.s32.totalorder %s1147_s21, %s1140_s30 }
  0x5c   : > { %p1144_p0 = pneg %p1143_p11  ;;  %p1150_p13 = por %p1149_p4, %p1148_p7 }
  0x5e   : > { %p1151_p6 = pnand %p1150_p13, %p1144_p0 }
  0x60   : > { %1154 = shalt.err (!%p1151_p6)
}
  0x61   : > { %957 = dma.hbm_to_vmem [thread:$0]  (!%p1425_p2), %s1421_s8, 64, %s1429_s26, %s173_s10  }
  0x62   : > { %192 = sbr.rel (%p1328_p8) target bundleno = 1342 (0x53e), region = 32  ;;  %s1459_s11 = sand.u32 (!%p1328_p8), 1, %s1225_s13  }
  0x63   : > { %s820_s18 = sshll.u32 (!%p1328_p8), %s1459_s11, 2  ;;  %s195_s25 = scalar_lea.sflag (!%p1328_p8), [#allocation6], %s1459_s11 }
  0x64   : > { %s1463_s27 = scalar_lea.vmem (!%p1328_p8), [#allocation5], %s820_s18  ;;  %p1573_p7 = scmp.ne.s32.totalorder (!%p1328_p8), %s1567_s22, 0 }
  0x69   : > { %1208 = dma.done.wait (%p1573_p7), %s195_s25, 64  }
  0x6a   : > { %1210 = vsyncadd (%p1573_p7), %s195_s25, 4294967232  ;;  %p1574_p2 = scmp.ne.s32.totalorder %s1565_s20, 0 }
  0x6c   : > { %1212 = dma.done.wait (%p1574_p2), [#allocation9], 4096  }
  0x6d   : > { %1214 = vsyncadd (%p1574_p2), [#allocation9], 4294963200  ;;  %v1250_v0 = vmov 0   ;;  %v1251_v1 = vmov 0.0   ;;  %v1025_v2 = vld [vmem:[#allocation8 + $0x4] ss:$12 sps:$4 sm:$0xff]  }
  0x6e   : > { %427 = vmatprep.mubr.bf16.mxu0 %v1250_v0  ;;  %883 = vmatprep.subr.bf16.mxu1 %v1251_v1  ;;  %v1027_v3 = vld [vmem:[#allocation8] ss:$12 sps:$4 sm:$0xff]   ;;  %v1028_v4 = vld [vmem:[#allocation8 + $0x1c] ss:$12 sps:$4 sm:$0xff]   ;;  %v1030_v5 = vld [vmem:[#allocation8 + $0x18] ss:$12 sps:$4 sm:$0xff]  }
  0x6f   : > { %395 = vmatprep.subr.bf16.mxu0 %v1025_v2  ;;  %v1031_v6 = vld [vmem:[#allocation8 + $0x34] ss:$12 sps:$4 sm:$0xff]   ;;  %v1033_v7 = vld [vmem:[#allocation8 + $0x30] ss:$12 sps:$4 sm:$0xff]   ;;  %v1034_v8 = vld [vmem:[#allocation8 + $0x4c] ss:$12 sps:$4 sm:$0xff]  }
  0x70   : > { %396 = vmatpush1.bf16.msra.mxu0 %v1027_v3  ;;  %v1036_v9 = vld [vmem:[#allocation8 + $0x48] ss:$12 sps:$4 sm:$0xff]   ;;  %v1037_v11 = vld [vmem:[#allocation8 + $0x64] ss:$12 sps:$4 sm:$0xff]   ;;  %v1050_v12 = vld [vmem:[#allocation8 + $0x20] ss:$12 sps:$4 sm:$0xff]  }
  0x71   : > { %397 = vmatprep.subr.bf16.mxu0 %v1028_v4  ;;  %v1049_v10 = vld [vmem:[#allocation8 + $0x8] ss:$12 sps:$4 sm:$0xff]   ;;  %v1039_v13 = vld [vmem:[#allocation8 + $0x60] ss:$12 sps:$4 sm:$0xff]   ;;  %v1042_v15 = vld [vmem:[#allocation8 + $0x78] ss:$12 sps:$4 sm:$0xff]  }
  0x72   : > { %884 = vmatpush3.bf16.msra.mxu1 %v1049_v10  ;;  %v1040_v14 = vld [vmem:[#allocation8 + $0x7c] ss:$12 sps:$4 sm:$0xff]   ;;  %v1051_v16 = vld [vmem:[#allocation8 + $0x38] ss:$12 sps:$4 sm:$0xff]   ;;  %v1043_v17 = vld [vmem:[#allocation8 + $0x94] ss:$12 sps:$4 sm:$0xff]  }
  0x73   : > { %885 = vmatprep.subr.bf16.mxu1 %v1251_v1  ;;  %v1052_v18 = vld [vmem:[#allocation8 + $0x50] ss:$12 sps:$4 sm:$0xff]   ;;  %v1046_v20 = vld [vmem:[#allocation8 + $0xac] ss:$12 sps:$4 sm:$0xff]   ;;  %v1053_v21 = vld [vmem:[#allocation8 + $0x68] ss:$12 sps:$4 sm:$0xff]  }
  0x74   : > { %398 = vmatpush1.bf16.msra.mxu0 %v1030_v5  ;;  %v1045_v19 = vld [vmem:[#allocation8 + $0x90] ss:$12 sps:$4 sm:$0xff]   ;;  %v1048_v22 = vld [vmem:[#allocation8 + $0xa8] ss:$12 sps:$4 sm:$0xff]   ;;  %v1054_v23 = vld [vmem:[#allocation8 + $0x80] ss:$12 sps:$4 sm:$0xff]  }
  0x75   : > { %399 = vmatprep.subr.bf16.mxu0 %v1031_v6  ;;  %v234_v24 = vld [vmem:[%s1463_s27] sm:$0xf]  ;;  %vm1252_vm0 = vmmov 0   ;;  %vm546_vm1 = vcmask 1043456   ;;  %vm530_vm2 = vcmask 64512   ;;  %v1057_v52 = vld [vmem:[#allocation10] sm:$0xff]  }
  0x76   : > { %886 = vmatpush3.bf16.msra.mxu1 %v1050_v12  ;;  %v1055_v25 = vld [vmem:[#allocation8 + $0x98] ss:$12 sps:$4 sm:$0xff]   ;;  %v1056_v26 = vld [vmem:[#allocation8 + $0xb0] ss:$12 sps:$4 sm:$0xff]   ;;  %899 = vmatprep.mubr.msk.bf16.mxu1 %vm1252_vm0, %v1251_v1  ;;  %v1058_v53 = vld [vmem:[#allocation10 + $0x8] sm:$0xff]   ;;  %s823_s20 = sshll.u32 %s1459_s11, 3 }
  0x77   : > { %887 = vmatprep.subr.bf16.mxu1 %v1251_v1  ;;  %v1059_v54 = vld [vmem:[#allocation10 + $0x10] sm:$0xff]   ;;  %v1060_v55 = vld [vmem:[#allocation10 + $0x18] sm:$0xff]   ;;  %v1061_v56 = vld [vmem:[#allocation10 + $0x20] sm:$0xff]   ;;  %s228_s22 = scalar_lea.vmem [#allocation11], %s823_s20  ;;  %s858_s8 = sshll.u32 %s1233_s15, 7 }
  0x78   : > { %400 = vmatpush1.bf16.msra.mxu0 %v1033_v7  ;;  %v1062_v57 = vld [vmem:[#allocation10 + $0x28] sm:$0xff]   ;;  %v1063_v58 = vld [vmem:[#allocation10 + $0x30] sm:$0xff]   ;;  %v1064_v63 = vld [vmem:[#allocation10 + $0x38] sm:$0xff]   ;;  %s711_s24 = sshll.u32 %s228_s22, 4  ;;  %s1510_s10 = scalar_lea.hbm %s1560_s3, %s858_s8  ;;  %s1505_s24 = int_to_ptr.vmem [resolvable:$true] %s711_s24 }
  0x79   : > { %401 = vmatprep.subr.bf16.mxu0 %v1034_v8  ;;  %s697_s29 = scalar_lea.sflag [#allocation7], %s1459_s11  ;;  %s1155_s4 = scalar_lea.vmem %s1505_s24, 128 }
  0x7a   : > { %888 = vmatpush3.bf16.msra.mxu1 %v1051_v16  ;;  %p1156_p8 = scmp.ne.s32.totalorder %s1505_s24, %s1155_s4  ;;  %p1575_p12 = scmp.ne.s32.totalorder %s1571_s28, 0 }
  0x7b   : > { %889 = vmatprep.subr.bf16.mxu1 %v1251_v1  ;;  %s1253_s15 = smov [#allocation11]  }
  0x7c   : > { %402 = vmatpush1.bf16.msra.mxu0 %v1036_v9  ;;  %p1157_p1 = pnand %p1156_p8, %p1575_p12  ;;  %s1159_s30 = sshll.u32 %s1253_s15, 4  ;;  %s1160_s30 = int_to_ptr.vmem [resolvable:$false] %s1159_s30 }
  0x7d   : > { %403 = vmatprep.subr.bf16.mxu0 %v1037_v11  ;;  %s1161_s6 = scalar_lea.vmem %s1160_s30, 256  ;;  %p1162_p3 = scmp.lt.s32.totalorder %s1505_s24, %s1160_s30 }
  0x7e   : > { %890 = vmatpush3.bf16.msra.mxu1 %v1052_v18  ;;  %p1158_p10 = pneg %p1157_p1  ;;  %p1163_p5 = scmp.lt.s32.totalorder %s1161_s6, %s1155_s4 }
  0x7f   : > { %891 = vmatprep.subr.bf16.mxu1 %v1251_v1 }
  0x80   : > { %404 = vmatpush1.bf16.msra.mxu0 %v1039_v13  ;;  %p1164_p9 = por %p1163_p5, %p1162_p3 }
  0x81   : > { %405 = vmatprep.subr.bf16.mxu0 %v1040_v14 }
  0x82   : > { %892 = vmatpush3.bf16.msra.mxu1 %v1053_v21  ;;  %p1165_p11 = pnand %p1164_p9, %p1158_p10 }
  0x83   : > { %893 = vmatprep.subr.bf16.mxu1 %v1251_v1 }
  0x84   : > { %406 = vmatpush1.bf16.msra.mxu0 %v1042_v15 }
  0x85   : > { %407 = vmatprep.subr.bf16.mxu0 %v1043_v17 }
  0x86   : > { %894 = vmatpush3.bf16.msra.mxu1 %v1054_v23 }
  0x87   : > { %895 = vmatprep.subr.bf16.mxu1 %v1251_v1 }
  0x88   : > { %408 = vmatpush1.bf16.msra.mxu0 %v1045_v19 }
  0x89   : > { %409 = vmatprep.subr.bf16.mxu0 %v1046_v20 }
  0x8a   : > { %896 = vmatpush3.bf16.msra.mxu1 %v1055_v25 }
  0x8b   : > { %897 = vmatprep.subr.bf16.mxu1 %v1251_v1 }
  0x8c   : > { %410 = vmatpush1.bf16.msra.mxu0 %v1048_v22 }
  0x8d   : > { %915 = vmatprep.subr.bf16.mxu0 %v1251_v1 }
  0x8e   : > { %898 = vmatpush3.bf16.msra.mxu1 %v1056_v26 }
  0x8f   : > { %428 = vmatmul.mubr.bf16.vlgmr.msra.gmra.mrb[0].mxu0 %v234_v24  ;;  %903 = vmatprep.subr.bf16.mxu1 %v1251_v1 }
  0x90   : > { %931 = vmatprep.mubr.msk.bf16.mxu0 %vm1252_vm0, %v1251_v1  ;;  %916 = vmatpush3.bf16.msra.mxu0 %v1057_v52 }
  0x91   : > { %900 = vmatmul.mubr.bf16.vlgmr.msra.gmra.mrb[0].mxu1 %v234_v24  ;;  %917 = vmatprep.subr.bf16.mxu0 %v1251_v1 }
  0x92   : > { %905 = vmatprep.mubr.msk.bf16.mxu1 %vm1252_vm0, %v1251_v1 }
  0x94   : > { %918 = vmatpush3.bf16.msra.mxu0 %v1058_v53 }
  0x95   : > { %919 = vmatprep.subr.bf16.mxu0 %v1251_v1 }
  0x98   : > { %920 = vmatpush3.bf16.msra.mxu0 %v1059_v54 }
  0x99   : > { %921 = vmatprep.subr.bf16.mxu0 %v1251_v1 }
  0x9c   : > { %922 = vmatpush3.bf16.msra.mxu0 %v1060_v55 }
  0x9d   : > { %923 = vmatprep.subr.bf16.mxu0 %v1251_v1 }
  0xa0   : > { %924 = vmatpush3.bf16.msra.mxu0 %v1061_v56 }
  0xa1   : > { %925 = vmatprep.subr.bf16.mxu0 %v1251_v1 }
  0xa4   : > { %926 = vmatpush3.bf16.msra.mxu0 %v1062_v57 }
  0xa5   : > { %927 = vmatprep.subr.bf16.mxu0 %v1251_v1 }
  0xa8   : > { %928 = vmatpush3.bf16.msra.mxu0 %v1063_v58 }
  0xa9   : > { %929 = vmatprep.subr.bf16.mxu0 %v1251_v1 }
  0xac   : > { %930 = vmatpush3.bf16.msra.mxu0 %v1064_v63 }
 0x162   : > { %v429_v27 = vpop.f32.mrb[0].mxu0 }
 0x163   : > { %v476_v28 = vpack.c.bf16 %v429_v27, %v429_v27  ;;  %v431_v29 = vpop.f32.mrb[1].mxu0 }
 0x164   : > { %v478_v30 = vpack.c.bf16 %v431_v29, %v431_v29  ;;  %v433_v31 = vpop.f32.mrb[2].mxu0  ;;  %v470_v35 = vpop.f32.mrb[0].mxu1 }
 0x165   : > { %477 = vst [vmem:[#allocation2] sm:$0xf] %v476_v28  ;;  %v434_v32 = vpop.f32.mrb[3].mxu0  ;;  %v480_v36 = vpack.c.bf16 %v470_v35, %v470_v35  ;;  %v901_v37 = vpop.f32.mrb[1].mxu1 }
 0x166   : > { %479 = vst [vmem:[#allocation3] sm:$0xf] %v478_v30  ;;  %v473_v38 = vpop.f32.mrb[2].mxu1 }
 0x167   : > { %481 = vst [vmem:[#allocation4] sm:$0xf] %v480_v36  ;;  %v902_v39 = vpop.f32.mrb[3].mxu1 }
 0x16c   : > { %v487_v34 = vld [vmem:[#allocation2] sm:$0xf] }
 0x16d   : > { %v488_v33 = vld [vmem:[#allocation3] sm:$0xf] }
 0x16e   : > { %904 = vmatpush3.bf16.xpose.msra.mxu1 %v488_v33  ;;  %v489_v40 = vld [vmem:[#allocation4] sm:$0xf] }
 0x16f   : > { %909 = vmatprep.subr.bf16.mxu1 %v1251_v1  ;;  %v548_v41 = vsel %vm546_vm1, %v489_v40, 0 }
 0x175   : > { %906 = vmatmul.mubr.bf16.vlgmr.msra.gmra.mrb[4].mxu1 %v487_v34 }
 0x176   : > { %911 = vmatprep.mubr.msk.bf16.mxu1 %vm1252_vm0, %v1251_v1  ;;  %910 = vmatpush3.bf16.msra.mxu1 %v548_v41 }
 0x248   : > { %v524_v42 = vpop.f32.mrb[4].mxu1 }
 0x249   : > { %v907_v43 = vpop.f32.mrb[5].mxu1  ;;  %v531_v44 = vsel %vm530_vm2, %v524_v42, -inf }
 0x24a   : > { %532 = vmax.xlane.f32.xlu0 %v531_v44  ;;  %v527_v45 = vpop.f32.mrb[6].mxu1 }
 0x24b   : > { %v908_v46 = vpop.f32.mrb[7].mxu1 }
 0x2d7   : > { %v533_v47 = vpop.xlane.xlu0 %532 }
 0x2d8   : > { %v534_v48 = vsub.f32 %v524_v42, %v533_v47 }
 0x2da   : > { %v535_v49 = vmul.f32 1.442695, %v534_v48 }
 0x2dc   : > { %1065 = vpow2.f32 %v535_v49 }
 0x2e6   : > { %v1066_v50 = vpop.eup %1065 }
 0x2e7   : > { %v537_v51 = vsel %vm530_vm2, %v1066_v50, 0.0 }
 0x2e8   : > { %538 = vadd.xlane.f32.xlu0 %v537_v51 }
 0x375   : > { %v539_v59 = vpop.xlane.xlu0 %538 }
 0x376   : > { %1067 = vrcp.f32 %v539_v59 }
 0x380   : > { %v1068_v60 = vpop.eup %1067 }
 0x381   : > { %v541_v61 = vmul.f32 %v1068_v60, %v1066_v50 }
 0x383   : > { %v542_v62 = vpack.c.bf16 %v541_v61, %v541_v61 }
 0x385   : > { %912 = vmatmul.mubr.msk.bf16.vlgmr.msra.gmra.mrb[8].mxu1 %vm530_vm2, %v542_v62 }
 0x458   : > { %v584_v0 = vpop.f32.mrb[8].mxu1 }
 0x459   : > { %v590_v2 = vpack.c.bf16 %v584_v0, %v584_v0  ;;  %v913_v3 = vpop.f32.mrb[9].mxu1 }
 0x45a   : > { %v587_v4 = vpop.f32.mrb[10].mxu1 }
 0x45b   : > { %v914_v5 = vpop.f32.mrb[11].mxu1  ;;  %932 = vmatmul.mubr.bf16.vlgmr.msra.gmra.mrb[4].mxu0 %v590_v2 }
 0x52e   : > { %v689_v1 = vpop.f32.mrb[4].mxu0 }
 0x52f   : > { %695 = vst [vmem:[%s228_s22] sm:$0xff] %v689_v1  ;;  %v933_v6 = vpop.f32.mrb[5].mxu0 }
 0x530   : > { %v692_v7 = vpop.f32.mrb[6].mxu0 }
 0x531   : > { %1168 = shalt.err (!%p1165_p11)
}
 0x532   : > { %s1169_s7 = scalar_lea.hbm %s1510_s10, 128  ;;  %s1173_s18 = scalar_lea.hbm %s1560_s3, 256 }
 0x533   : > { %p1170_p0 = scmp.ne.s32.totalorder %s1510_s10, %s1169_s7  ;;  %p1174_p6 = scmp.lt.u32.totalorder %s1510_s10, %s1560_s3 }
 0x534   : > { %p1175_p7 = scmp.lt.u32.totalorder %s1173_s18, %s1169_s7  ;;  %p1177_p8 = scmp.lt.u32.totalorder %s1169_s7, %s1510_s10 }
 0x535   : > { %p1171_p4 = pnand %p1170_p0, %p1575_p12 }
 0x536   : > { %p1176_p2 = por %p1175_p7, %p1174_p6 }
 0x537   : > { %p1172_p13 = pneg %p1171_p4 }
 0x538   : > { %p1178_p1 = por %p1177_p8, %p1176_p2 }
 0x53a   : > { %p1179_p10 = pnand %p1178_p1, %p1172_p13 }
 0x53c   : > { %1182 = shalt.err (!%p1179_p10)
}
 0x53d   : > { %945 = dma.vmem_to_hbm [thread:$0]  (%p1575_p12), %s1505_s24, 128, %s1510_s10, %s697_s29   ;;  %v934_v8 = vpop.f32.mrb[7].mxu0 }
 0x53e PF: > { %s723_s20 = sand.u32 1, %s1221_s12   ;;  %p1576_p3 = scmp.ne.s32.totalorder %s1568_s23, 0 }
 0x53f   : > { %p1577_p5 = scmp.ge.s32.totalorder %s1241_s17, 2  ;;  %s724_s22 = scalar_lea.sflag [#allocation7], %s723_s20 }
 0x541   : > { %p959_p9 = pnand %p1577_p5, %p1576_p3 }
 0x543   : > { %1216 = dma.done.wait (!%p959_p9), %s724_s22, 128  }
 0x544   : > { %1218 = vsyncadd (!%p959_p9), %s724_s22, 4294967168  ;;  %s20_s17 = sadd.s32 1, %s1241_s17   ;;  %s1578_s12 = smov %s1225_s13 }
 0x545   : > { %p17_p11 = scmp.ge.s32.totalorder %s20_s17, 4   ;;  %s1579_s13 = smov %s1229_s14 }
 0x546   : > { %s1580_s14 = smov %s1416_s5  ;;  %s1581_s15 = smov %s1237_s16 }
 0x547   : > { %s1582_s16 = smov %s1584_s19  ;;  %19 = sbr.rel (!%p17_p11) target bundleno = 7 (0x7), region = 90 }
 0x54e   :  { %729 = vsyncpa [#allocation6], 1 }
 0x54f   :  { %731 = vsyncpa [#allocation6 + $0x1], 1 }
 0x550   :  { %732 = vsyncpa [#allocation9], 1 }
 0x551   :  { %733 = vsyncpa [#allocation7], 1 }
 0x552   :  { %735 = vsyncpa [#allocation7 + $0x1], 1 }

</bundles_post_ra>
